<compile_context>
chip_gen: v5e
topology: v5e:2x2
jax: 0.10.0
libtpu: 0.0.40
codegen_flags: <defaults>
</compile_context>

<pallas_src>
import functools

import jax
import jax.numpy as jnp
from jax.experimental import pallas as pl
from jax.experimental.pallas import tpu as pltpu  # noqa: F401  (available if dims grow)


# ------------------------------- Utilities -------------------------------- #

_LANE = 128   # lane width (last dim)
_SUB = 8      # sublane width (second-to-last dim)


def _round_up(n: int, m: int) -> int:
    return ((n + m - 1) // m) * m


# ----------------------------- Pallas kernel ------------------------------ #

def _fused_mlp_kernel(*refs, n_layers: int):
    """Fully fused MLP.

    refs layout: (x_ref, w0_ref, b0_ref, w1_ref, b1_ref, ..., o_ref)
    Every ref is a full-array VMEM block (shapes are small and lane-padded),
    so intermediate activations live entirely in VMEM/vregs — no HBM
    writeback between layers.
    """
    x_ref = refs[0]
    o_ref = refs[-1]

    h = x_ref[...]                                   # (B_pad, in_pad) f32
    for i in range(n_layers):                        # unrolled at trace time
        w = refs[1 + 2 * i][...]                     # (in_pad, out_pad)
        b = refs[2 + 2 * i][...]                     # (1, out_pad)
        h = jnp.dot(h, w, preferred_element_type=jnp.float32) + b
        if i < n_layers - 1:
            h = jnp.tanh(h)                          # EUP transcendental, f32
    o_ref[...] = h.astype(o_ref.dtype)


def decoder_forward_fused(padded_params, x, output_dim):
    """Run the whole Decoder MLP in ONE pallas_call.

    padded_params: list of (w_t_pad, b_pad) with
        w_t_pad: (in_pad, out_pad) f32, zero-padded
        b_pad:   (1, out_pad) f32, zero-padded
    x: (B, input_dim) f32 (unpadded); output: (B, output_dim) f32.
    """
    n_layers = len(padded_params)
    B, d_in = x.shape
    in_pad = padded_params[0][0].shape[0]
    out_pad_last = padded_params[-1][0].shape[1]
    B_pad = _round_up(max(B, _SUB), _SUB)

    # Pad the input once in the wrapper (zeros in padded lanes/rows are inert).
    x_pad = jnp.zeros((B_pad, in_pad), x.dtype).at[:B, :d_in].set(x)

    # Flat operand list: x, then (w, b) per layer.
    operands = [x_pad]
    for w_t, b in padded_params:
        operands.append(w_t)
        operands.append(b)

    in_specs = [pl.BlockSpec(op.shape, lambda: (0, 0)) for op in operands]

    kernel = functools.partial(_fused_mlp_kernel, n_layers=n_layers)
    out_pad = pl.pallas_call(
        kernel,
        out_shape=jax.ShapeDtypeStruct((B_pad, out_pad_last), x.dtype),
        in_specs=in_specs,
        out_specs=pl.BlockSpec((B_pad, out_pad_last), lambda: (0, 0)),
        # NOTE: at these sizes everything fits comfortably in the default
        # scoped VMEM; if fc_dims grow, set
        #   compiler_params=pltpu.CompilerParams(vmem_limit_bytes=...)
        # and add a batch grid axis marked "parallel" (v7x has 2 TCs).
    )(*operands)

    # Slice away batch/feature padding outside the kernel.
    return out_pad[:B, :output_dim]


# ------------------------- Parameter construction ------------------------- #

def init_decoder_params(key, input_dim, fc_dims, output_dim):
    """Mirror torch.nn.Linear default init (U(-1/sqrt(in), 1/sqrt(in))).

    Returns UNPADDED params: list of (w_t, b) with
        w_t: (d_in, d_out) f32  (pre-transposed), b: (1, d_out) f32.
    """
    dims = [input_dim] + list(fc_dims) + [output_dim]
    params = []
    for i in range(len(dims) - 1):
        d_in, d_out = dims[i], dims[i + 1]
        key, kw, kb = jax.random.split(key, 3)
        bound = 1.0 / jnp.sqrt(jnp.float32(d_in))
        w = jax.random.uniform(kw, (d_out, d_in), jnp.float32, -bound, bound)
        b = jax.random.uniform(kb, (d_out,), jnp.float32, -bound, bound)
        params.append((w.T, b.reshape(1, d_out)))
    return params


def pad_decoder_params(params):
    """Zero-pad every weight to (in_pad, out_pad) and bias to (1, out_pad),
    with in_pad/out_pad = next multiple of 128 (lane-dense layouts)."""
    padded = []
    for w_t, b in params:
        d_in, d_out = w_t.shape
        in_pad = _round_up(d_in, _LANE)
        out_pad = _round_up(d_out, _LANE)
        w_pad = jnp.zeros((in_pad, out_pad), w_t.dtype).at[:d_in, :d_out].set(w_t)
        b_pad = jnp.zeros((1, out_pad), b.dtype).at[:, :d_out].set(b)
        padded.append((w_pad, b_pad))
    return padded


# ------------------------------ Reference --------------------------------- #

def decoder_reference(params, x):
    """Pure-JAX reference (unpadded) for correctness check."""
    n = len(params)
    for i, (w_t, b) in enumerate(params):
        x = x @ w_t + b
        if i < n - 1:
            x = jnp.tanh(x)
    return x


# ---------------------------------- Main ----------------------------------- #

if __name__ == "__main__":
    batch = 8
    input_dim = 32
    fc_dims = [64, 48]
    output_dim = 16

    key = jax.random.PRNGKey(0)
    key, kx = jax.random.split(key)
    x = jax.random.normal(kx, (batch, input_dim), jnp.float32)

    params = init_decoder_params(key, input_dim, fc_dims, output_dim)
    padded_params = pad_decoder_params(params)

    fwd = jax.jit(functools.partial(decoder_forward_fused, output_dim=output_dim))
    out = fwd(padded_params, x)
    out = jax.block_until_ready(out)

    ref = decoder_reference(params, x)
    assert out.shape == (batch, output_dim), out.shape
    assert jnp.allclose(out, ref, atol=1e-5, rtol=1e-5), "mismatch vs reference"

    print("KERNEL_OK")
</pallas_src>

<mosaic_0001>
module attributes {stable_mosaic.version = 11 : i64} {
  func.func @_fused_mlp_kernel(%arg0: memref<8x128xf32, #tpu.memory_space<vmem>>, %arg1: memref<128x128xf32, #tpu.memory_space<vmem>>, %arg2: memref<1x128xf32, #tpu.memory_space<vmem>>, %arg3: memref<128x128xf32, #tpu.memory_space<vmem>>, %arg4: memref<1x128xf32, #tpu.memory_space<vmem>>, %arg5: memref<128x128xf32, #tpu.memory_space<vmem>>, %arg6: memref<1x128xf32, #tpu.memory_space<vmem>>, %arg7: memref<8x128xf32, #tpu.memory_space<vmem>>) attributes {dimension_semantics = [], scalar_prefetch = 0 : i64, scratch_operands = 0 : i64, tpu.core_type = #tpu.core_type<tc>} {
    %c0 = arith.constant 0 : index
    %c0_0 = arith.constant 0 : index
    %0 = vector.load %arg0[%c0, %c0_0] : memref<8x128xf32, #tpu.memory_space<vmem>>, vector<8x128xf32>
    %c0_1 = arith.constant 0 : index
    %c0_2 = arith.constant 0 : index
    %1 = vector.load %arg1[%c0_1, %c0_2] : memref<128x128xf32, #tpu.memory_space<vmem>>, vector<128x128xf32>
    %c0_3 = arith.constant 0 : index
    %c0_4 = arith.constant 0 : index
    %2 = vector.load %arg2[%c0_3, %c0_4] : memref<1x128xf32, #tpu.memory_space<vmem>>, vector<1x128xf32>
    %cst = arith.constant dense<0.000000e+00> : vector<8x128xf32>
    %3 = tpu.matmul %0, %1, %cst {dimension_numbers = #tpu.dot_dimension_numbers<[1], [0], [0], [1], [0, 0, 1, 1], [], []>} : vector<8x128xf32>, vector<128x128xf32>, vector<8x128xf32> -> vector<8x128xf32>
    %4 = vector.broadcast %2 : vector<1x128xf32> to vector<8x128xf32>
    %5 = arith.addf %3, %4 : vector<8x128xf32>
    %6 = math.tanh %5 : vector<8x128xf32>
    %c0_5 = arith.constant 0 : index
    %c0_6 = arith.constant 0 : index
    %7 = vector.load %arg3[%c0_5, %c0_6] : memref<128x128xf32, #tpu.memory_space<vmem>>, vector<128x128xf32>
    %c0_7 = arith.constant 0 : index
    %c0_8 = arith.constant 0 : index
    %8 = vector.load %arg4[%c0_7, %c0_8] : memref<1x128xf32, #tpu.memory_space<vmem>>, vector<1x128xf32>
    %cst_9 = arith.constant dense<0.000000e+00> : vector<8x128xf32>
    %9 = tpu.matmul %6, %7, %cst_9 {dimension_numbers = #tpu.dot_dimension_numbers<[1], [0], [0], [1], [0, 0, 1, 1], [], []>} : vector<8x128xf32>, vector<128x128xf32>, vector<8x128xf32> -> vector<8x128xf32>
    %10 = vector.broadcast %8 : vector<1x128xf32> to vector<8x128xf32>
    %11 = arith.addf %9, %10 : vector<8x128xf32>
    %12 = math.tanh %11 : vector<8x128xf32>
    %c0_10 = arith.constant 0 : index
    %c0_11 = arith.constant 0 : index
    %13 = vector.load %arg5[%c0_10, %c0_11] : memref<128x128xf32, #tpu.memory_space<vmem>>, vector<128x128xf32>
    %c0_12 = arith.constant 0 : index
    %c0_13 = arith.constant 0 : index
    %14 = vector.load %arg6[%c0_12, %c0_13] : memref<1x128xf32, #tpu.memory_space<vmem>>, vector<1x128xf32>
    %cst_14 = arith.constant dense<0.000000e+00> : vector<8x128xf32>
    %15 = tpu.matmul %12, %13, %cst_14 {dimension_numbers = #tpu.dot_dimension_numbers<[1], [0], [0], [1], [0, 0, 1, 1], [], []>} : vector<8x128xf32>, vector<128x128xf32>, vector<8x128xf32> -> vector<8x128xf32>
    %16 = vector.broadcast %14 : vector<1x128xf32> to vector<8x128xf32>
    %17 = arith.addf %15, %16 : vector<8x128xf32>
    %c0_15 = arith.constant 0 : index
    %c0_16 = arith.constant 0 : index
    %18 = vector.load %arg7[%c0_15, %c0_16] : memref<8x128xf32, #tpu.memory_space<vmem>>, vector<8x128xf32>
    tpu.vector_store %arg7[%c0_15, %c0_16], %17 {strides = array<i32>} : memref<8x128xf32, #tpu.memory_space<vmem>>, vector<8x128xf32>,
    return
  }
}

</mosaic_0001>

<bundles_post_ra>
// kernel: decoder_forward_fused.1
= control target key start
LH: loop header
LB: loop body
LE: loop exit
PB: predicated region body
PF: predicated region fallthrough
CT: control target
= control target key end

     0   :  { %12 = vsyncpa [#allocation3], 0  ;;  %s401_s0 = inlined_call_operand.vmem [shape: f32[8,128], index: 0, kind: input, shape index: {}]   ;;  %s402_s1 = inlined_call_operand.hbm [shape: f32[128,128], index: 1, kind: input, shape index: {}]   ;;  %s403_s2 = inlined_call_operand.vmem [shape: f32[1,128], index: 2, kind: input, shape index: {}]   ;;  %s404_s3 = inlined_call_operand.hbm [shape: f32[128,128], index: 3, kind: input, shape index: {}]   ;;  %s405_s4 = inlined_call_operand.vmem [shape: f32[1,128], index: 4, kind: input, shape index: {}]   ;;  %s406_s5 = inlined_call_operand.hbm [shape: f32[128,128], index: 5, kind: input, shape index: {}]   ;;  %s407_s6 = inlined_call_operand.vmem [shape: f32[1,128], index: 6, kind: input, shape index: {}]   ;;  %s408_s7 = inlined_call_operand.hbm [shape: f32[8,128], index: 7, kind: output, shape index: {}]  }
   0x1   :  { %13 = vsyncpa [#allocation6], 0 }
   0x2   :  { %14 = vsyncpa [#allocation4], 0  ;;  %s36_s26 = sshll.u32 %s404_s3, 4  ;;  %s331_s27 = smov [#allocation5]   ;;  %s37_s26 = int_to_ptr.hbm [resolvable:$true] %s36_s26 }
   0x3   :  { %s38_s28 = sshll.u32 %s331_s27, 4  ;;  %s21_s8 = sshll.u32 %s402_s1, 4  ;;  %s39_s28 = int_to_ptr.vmem [resolvable:$true] %s38_s28  ;;  %s22_s8 = int_to_ptr.hbm [resolvable:$true] %s21_s8 }
   0x4   :  { %s332_s9 = smov 128   ;;  %s333_s10 = smov 8  }
   0x5   :  { %44 = dma.hbm_to_vmem [thread:$0]  %s37_s26, 2048, %s39_s28, [#allocation6], %s332_s9, %s332_s9, %s333_s10  }
   0x6   :  { %s334_s11 = smov [#allocation2]   ;;  %s51_s15 = sshll.u32 %s406_s5, 4  ;;  %s52_s15 = int_to_ptr.hbm [resolvable:$true] %s51_s15 }
   0x7   :  { %s23_s12 = sshll.u32 %s334_s11, 4  ;;  %s335_s3 = smov [#allocation7]   ;;  %s24_s12 = int_to_ptr.vmem [resolvable:$true] %s23_s12 }
   0x8   :  { %29 = dma.hbm_to_vmem [thread:$0]  %s22_s8, 2048, %s24_s12, [#allocation3], %s332_s9, %s332_s9, %s333_s10  }
   0x9   :  { %s53_s16 = sshll.u32 %s335_s3, 4  ;;  %s54_s16 = int_to_ptr.vmem [resolvable:$true] %s53_s16 }
   0xa   :  { %59 = dma.hbm_to_vmem [thread:$0]  %s52_s15, 2048, %s54_s16, [#allocation6], %s332_s9, %s332_s9, %s333_s10  }
   0xb   :  { %325 = dma.done.wait [#allocation3], 2048  }
   0xc   :  { %326 = vsyncadd [#allocation3], 4294965248 }
   0xd   :  { %327 = dma.done.wait [#allocation6], 4096  }
   0xe   :  { %328 = vsyncadd [#allocation6], 4294963200  ;;  %v90_v0 = vld [vmem:[#allocation2 + $0x78] sm:$0xff]  ;;  %v89_v1 = vld [vmem:[#allocation2 + $0x70] sm:$0xff]  ;;  %s336_s21 = smov [#allocation8]   ;;  %s205_s25 = sshll.u32 %s408_s7, 4  ;;  %s206_s25 = int_to_ptr.hbm [resolvable:$true] %s205_s25 }
   0xf   :  { %95 = vmatpush.msra.mxu0 %v90_v0  ;;  %v88_v2 = vld [vmem:[#allocation2 + $0x68] sm:$0xff]  ;;  %v87_v3 = vld [vmem:[#allocation2 + $0x60] sm:$0xff]  ;;  %v131_v4 = vld [vmem:[#allocation5 + $0x78] sm:$0xff]  ;;  %s203_s22 = sshll.u32 %s336_s21, 4  ;;  %s204_s22 = int_to_ptr.vmem [resolvable:$true] %s203_s22 }
  0x10   :  { %v86_v5 = vld [vmem:[#allocation2 + $0x58] sm:$0xff]  ;;  %136 = vmatpush.msra.mxu1 %v131_v4  ;;  %v130_v6 = vld [vmem:[#allocation5 + $0x70] sm:$0xff]  ;;  %v129_v7 = vld [vmem:[#allocation5 + $0x68] sm:$0xff] }
  0x11   :  { %96 = vmatpush.msra.mxu0 %v89_v1  ;;  %v85_v8 = vld [vmem:[#allocation2 + $0x50] sm:$0xff]  ;;  %v128_v9 = vld [vmem:[#allocation5 + $0x60] sm:$0xff]  ;;  %v84_v10 = vld [vmem:[#allocation2 + $0x48] sm:$0xff] }
  0x12   :  { %137 = vmatpush.msra.mxu1 %v130_v6  ;;  %v127_v11 = vld [vmem:[#allocation5 + $0x58] sm:$0xff]  ;;  %v83_v12 = vld [vmem:[#allocation2 + $0x40] sm:$0xff]  ;;  %v126_v13 = vld [vmem:[#allocation5 + $0x50] sm:$0xff] }
  0x13   :  { %97 = vmatpush.msra.mxu0 %v88_v2  ;;  %v82_v14 = vld [vmem:[#allocation2 + $0x38] sm:$0xff]  ;;  %v125_v15 = vld [vmem:[#allocation5 + $0x48] sm:$0xff]  ;;  %v81_v16 = vld [vmem:[#allocation2 + $0x30] sm:$0xff] }
  0x14   :  { %138 = vmatpush.msra.mxu1 %v129_v7  ;;  %v124_v17 = vld [vmem:[#allocation5 + $0x40] sm:$0xff]  ;;  %v80_v18 = vld [vmem:[#allocation2 + $0x28] sm:$0xff]  ;;  %v123_v19 = vld [vmem:[#allocation5 + $0x38] sm:$0xff] }
  0x15   :  { %98 = vmatpush.msra.mxu0 %v87_v3  ;;  %v79_v20 = vld [vmem:[#allocation2 + $0x20] sm:$0xff]  ;;  %v122_v21 = vld [vmem:[#allocation5 + $0x30] sm:$0xff]  ;;  %v78_v22 = vld [vmem:[#allocation2 + $0x18] sm:$0xff] }
  0x16   :  { %139 = vmatpush.msra.mxu1 %v128_v9  ;;  %v121_v23 = vld [vmem:[#allocation5 + $0x28] sm:$0xff]  ;;  %v77_v24 = vld [vmem:[#allocation2 + $0x10] sm:$0xff]  ;;  %v75_v26 = vld [vmem:[#allocation2] sm:$0xff] }
  0x17   :  { %99 = vmatpush.msra.mxu0 %v86_v5  ;;  %v76_v25 = vld [vmem:[#allocation2 + $0x8] sm:$0xff]  ;;  %v74_v27 = vld [vmem:[%s401_s0] sm:$0xff]  ;;  %v119_v29 = vld [vmem:[#allocation5 + $0x18] sm:$0xff] }
  0x18   :  { %140 = vmatpush.msra.mxu1 %v127_v11  ;;  %v120_v28 = vld [vmem:[#allocation5 + $0x20] sm:$0xff]  ;;  %v118_v30 = vld [vmem:[#allocation5 + $0x10] sm:$0xff]  ;;  %v117_v31 = vld [vmem:[#allocation5 + $0x8] sm:$0xff] }
  0x19   :  { %100 = vmatpush.msra.mxu0 %v85_v8  ;;  %v116_v32 = vld [vmem:[#allocation5] sm:$0xff]  ;;  %v172_v33 = vld [vmem:[#allocation7 + $0x78] sm:$0xff]  ;;  %v171_v34 = vld [vmem:[#allocation7 + $0x70] sm:$0xff] }
  0x1a   :  { %141 = vmatpush.msra.mxu1 %v126_v13  ;;  %177 = vmatpush.msra.mxu2 %v172_v33  ;;  %v170_v35 = vld [vmem:[#allocation7 + $0x68] sm:$0xff]  ;;  %v169_v36 = vld [vmem:[#allocation7 + $0x60] sm:$0xff]  ;;  %v168_v37 = vld [vmem:[#allocation7 + $0x58] sm:$0xff] }
  0x1b   :  { %101 = vmatpush.msra.mxu0 %v84_v10  ;;  %v167_v38 = vld [vmem:[#allocation7 + $0x50] sm:$0xff]  ;;  %v166_v39 = vld [vmem:[#allocation7 + $0x48] sm:$0xff]  ;;  %v165_v40 = vld [vmem:[#allocation7 + $0x40] sm:$0xff] }
  0x1c   :  { %142 = vmatpush.msra.mxu1 %v125_v15  ;;  %178 = vmatpush.msra.mxu2 %v171_v34  ;;  %v164_v41 = vld [vmem:[#allocation7 + $0x38] sm:$0xff]  ;;  %v163_v42 = vld [vmem:[#allocation7 + $0x30] sm:$0xff]  ;;  %v162_v43 = vld [vmem:[#allocation7 + $0x28] sm:$0xff] }
  0x1d   :  { %102 = vmatpush.msra.mxu0 %v83_v12  ;;  %v222_v44 = vld [vmem:[%s403_s2] ss:$0 sm:$0xff]  ;;  %v160_v49 = vld [vmem:[#allocation7 + $0x18] sm:$0xff]  ;;  %v159_v50 = vld [vmem:[#allocation7 + $0x10] sm:$0xff] }
  0x1e   :  { %143 = vmatpush.msra.mxu1 %v124_v17  ;;  %179 = vmatpush.msra.mxu2 %v170_v35  ;;  %v161_v48 = vld [vmem:[#allocation7 + $0x20] sm:$0xff]  ;;  %v158_v51 = vld [vmem:[#allocation7 + $0x8] sm:$0xff] }
  0x1f   :  { %103 = vmatpush.msra.mxu0 %v82_v14  ;;  %v157_v52 = vld [vmem:[#allocation7] sm:$0xff] }
  0x20   :  { %144 = vmatpush.msra.mxu1 %v123_v19  ;;  %180 = vmatpush.msra.mxu2 %v169_v36  ;;  %v223_v53 = vld [vmem:[%s405_s4] ss:$0 sm:$0xff] }
  0x21   :  { %104 = vmatpush.msra.mxu0 %v81_v16  ;;  %v224_v57 = vld [vmem:[%s407_s6] ss:$0 sm:$0xff] }
  0x22   :  { %145 = vmatpush.msra.mxu1 %v122_v21  ;;  %181 = vmatpush.msra.mxu2 %v168_v37 }
  0x23   :  { %105 = vmatpush.msra.mxu0 %v80_v18 }
  0x24   :  { %146 = vmatpush.msra.mxu1 %v121_v23  ;;  %182 = vmatpush.msra.mxu2 %v167_v38 }
  0x25   :  { %106 = vmatpush.msra.mxu0 %v79_v20 }
  0x26   :  { %147 = vmatpush.msra.mxu1 %v120_v28  ;;  %183 = vmatpush.msra.mxu2 %v166_v39 }
  0x27   :  { %107 = vmatpush.msra.mxu0 %v78_v22 }
  0x28   :  { %148 = vmatpush.msra.mxu1 %v119_v29  ;;  %184 = vmatpush.msra.mxu2 %v165_v40 }
  0x29   :  { %108 = vmatpush.msra.mxu0 %v77_v24 }
  0x2a   :  { %149 = vmatpush.msra.mxu1 %v118_v30  ;;  %185 = vmatpush.msra.mxu2 %v164_v41 }
  0x2b   :  { %109 = vmatpush.msra.mxu0 %v76_v25 }
  0x2c   :  { %150 = vmatpush.msra.mxu1 %v117_v31  ;;  %186 = vmatpush.msra.mxu2 %v163_v42 }
  0x2d   :  { %110 = vmatpush.msra.mxu0 %v75_v26 }
  0x2e   :  { %111 = vmatmul.f32.vlgmr.msra.gmra.mxu0 %v74_v27  ;;  %151 = vmatpush.msra.mxu1 %v116_v32 }
  0x2f   :  { %187 = vmatpush.msra.mxu2 %v162_v43 }
  0x31   :  { %188 = vmatpush.msra.mxu2 %v161_v48 }
  0x33   :  { %189 = vmatpush.msra.mxu2 %v160_v49 }
  0x35   :  { %190 = vmatpush.msra.mxu2 %v159_v50 }
  0x37   :  { %191 = vmatpush.msra.mxu2 %v158_v51 }
  0x39   :  { %192 = vmatpush.msra.mxu2 %v157_v52 }
  0xab   :  { %v112_v45 = vpop.f32.mrf.mxu0 }
  0xac   :  { %v113_v46 = vadd.f32 %v222_v44, %v112_v45 }
  0xae   :  { %225 = vtanh.f32 %v113_v46 }
  0xb4   :  { %v226_v47 = vpop.eup %225 }
  0xb5   :  { %152 = vmatmul.f32.vlgmr.msra.gmra.mxu1 %v226_v47 }
 0x132   :  { %v153_v54 = vpop.f32.mrf.mxu1 }
 0x133   :  { %v154_v55 = vadd.f32 %v223_v53, %v153_v54 }
 0x135   :  { %227 = vtanh.f32 %v154_v55 }
 0x13b   :  { %v228_v56 = vpop.eup %227 }
 0x13c   :  { %193 = vmatmul.f32.vlgmr.msra.gmra.mxu2 %v228_v56 }
 0x1bf   :  { %v194_v58 = vpop.f32.mrf.mxu2 }
 0x1c0   :  { %v195_v59 = vadd.f32 %v224_v57, %v194_v58 }
 0x1c2   :  { %197 = vst [vmem:[#allocation8] sm:$0xff] %v195_v59 }
 0x1c3   :  { %208 = dma.vmem_to_hbm [thread:$0]  %s204_s22, 128, %s206_s25, [#allocation4]  }
 0x1c4   :  { %329 = dma.done.wait [#allocation4], 128  }
 0x1c5   :  { %330 = vsyncadd [#allocation4], 4294967168 }
 0x1c6   :  { %213 = vsyncpa [#allocation3], 1 }
 0x1c7   :  { %214 = vsyncpa [#allocation6], 1 }
 0x1c8   :  { %215 = vsyncpa [#allocation4], 1 }

</bundles_post_ra>
